<compile_context>
chip_gen: v7x
topology: tpu7x:2x2x1
jax: 0.10.0
libtpu: 0.0.40
codegen_flags: <defaults>
</compile_context>

<pallas_src>
import jax
import jax.numpy as jnp
from jax.experimental import pallas as pl
from jax.experimental.pallas import tpu as pltpu


def _inv_softplus(x):
    return jnp.log(jnp.expm1(x))


def _round_up(v, m):
    return ((v + m - 1) // m) * m


def _quadexp_kernel_vpu(a2_ref, c_ref, xt_ref, y_ref, o_ref):
    """Direct diff-square distance on the VPU (small d: the mgplvm case).

    a2_ref, c_ref : SMEM (n,) f32 -- alpha^2 and -0.5/ell^2 per n
    xt_ref : VMEM (NB, TM, d)  (x pre-transposed in the wrapper)
    y_ref  : VMEM (NB, d, TN)
    o_ref  : VMEM (NB, TM, TN)
    """
    g = pl.program_id(0)
    nb, _, d = xt_ref.shape
    for b in range(nb):                          # static unroll over n sub-batch
        xt = xt_ref[b]                           # (TM, d)  rows -> sublanes
        yb = y_ref[b]                            # (d, TN)  cols -> lanes
        acc = jnp.zeros(o_ref.shape[1:], jnp.float32)
        for k in range(d):                       # static unroll, d is tiny
            diff = xt[:, k:k + 1] - yb[k:k + 1, :]
            acc = acc + diff * diff
        idx = g * nb + b
        o_ref[b] = (a2_ref[idx] * jnp.exp(acc * c_ref[idx])).astype(o_ref.dtype)


def _quadexp_kernel_mxu(a2_ref, c_ref, xt_ref, y_ref, xx_ref, yy_ref, o_ref):
    """Norm-expansion distance on the MXU (only used for large d >= 64)."""
    g = pl.program_id(0)
    nb = xt_ref.shape[0]
    for b in range(nb):
        xy = jax.lax.dot_general(
            xt_ref[b], y_ref[b],
            dimension_numbers=(((1,), (0,)), ((), ())),
            preferred_element_type=jnp.float32)              # (TM, TN)
        dist = jnp.maximum(xx_ref[b] + yy_ref[b] - 2.0 * xy, 0.0)
        idx = g * nb + b
        o_ref[b] = (a2_ref[idx] * jnp.exp(dist * c_ref[idx])).astype(o_ref.dtype)


def quadexp_forward(x, y, raw_alpha, raw_ell, *, tile_m=512, tile_n=512):
    """QuadExp.forward: x (n, d, mx), y (n, d, my) -> K (n, mx, my) float32."""
    x = jnp.asarray(x, jnp.float32)
    y = jnp.asarray(y, jnp.float32)
    n, d, mx = x.shape
    n2, d2, my = y.shape
    assert n == n2 and d == d2

    alpha = jax.nn.softplus(jnp.asarray(raw_alpha, jnp.float32))
    ell = jax.nn.softplus(jnp.asarray(raw_ell, jnp.float32))
    a2 = alpha * alpha                       # per-n output scale
    c = -0.5 / (ell * ell)                   # folded exponent scale

    # Lane-dense / sublane-aligned tile sizes and padded extents.
    tn = min(tile_n, _round_up(my, 128))     # multiple of 128 -> unmasked vst
    tm = min(tile_m, _round_up(mx, 8))       # multiple of 8 sublanes
    mx_p = _round_up(mx, tm)
    my_p = _round_up(my, tn)

    # Small-problem regime: fold several n into one grid step when the whole
    # padded (mx_p, my_p) slab is tiny, amortizing per-step overhead.
    nb = 1
    if mx_p == tm and my_p == tn and tm * tn * 4 <= (1 << 20):
        cap = max(1, (1 << 20) // (tm * tn * 4))
        for b in range(min(n, cap, 8), 0, -1):
            if n % b == 0:
                nb = b
                break

    # Wrapper-side layout: x transposed to (n, mx, d) so the kernel never
    # transposes; zero-pad mx / my so every tile is full (sliced off below).
    xt = jnp.swapaxes(x, 1, 2)                               # (n, mx, d)
    if mx_p != mx:
        xt = jnp.pad(xt, ((0, 0), (0, mx_p - mx), (0, 0)))
    yp = y if my_p == my else jnp.pad(y, ((0, 0), (0, 0), (0, my_p - my)))

    grid = (n // nb, mx_p // tm, my_p // tn)   # my-tile innermost: x stays resident
    smem_spec = pl.BlockSpec(memory_space=pltpu.SMEM)
    x_spec = pl.BlockSpec((nb, tm, d), lambda i, jm, jn: (i, jm, 0))
    y_spec = pl.BlockSpec((nb, d, tn), lambda i, jm, jn: (i, 0, jn))
    o_spec = pl.BlockSpec((nb, tm, tn), lambda i, jm, jn: (i, jm, jn))

    if d >= 64:
        # Large contraction: MXU norm-expansion with precomputed squared norms.
        xx = jnp.sum(xt * xt, axis=-1, keepdims=True)        # (n, mx_p, 1)
        yy = jnp.sum(yp * yp, axis=1, keepdims=True)         # (n, 1, my_p)
        kernel = _quadexp_kernel_mxu
        operands = (a2, c, xt, yp, xx, yy)
        in_specs = [smem_spec, smem_spec, x_spec, y_spec,
                    pl.BlockSpec((nb, tm, 1), lambda i, jm, jn: (i, jm, 0)),
                    pl.BlockSpec((nb, 1, tn), lambda i, jm, jn: (i, 0, jn))]
    else:
        kernel = _quadexp_kernel_vpu
        operands = (a2, c, xt, yp)
        in_specs = [smem_spec, smem_spec, x_spec, y_spec]

    # VMEM budget: double-buffered out/x/y tiles, clamped below v7x's 64 MiB.
    tile_bytes = 2 * 4 * nb * (tm * tn + tm * d + d * tn)
    vmem_limit = int(min(max(tile_bytes + (4 << 20), 32 << 20), 56 << 20))

    out = pl.pallas_call(
        kernel,
        out_shape=jax.ShapeDtypeStruct((n, mx_p, my_p), jnp.float32),
        grid=grid,
        in_specs=in_specs,
        out_specs=o_spec,
        compiler_params=pltpu.CompilerParams(
            dimension_semantics=("parallel", "parallel", "parallel"),
            vmem_limit_bytes=vmem_limit),
    )(*operands)

    return out[:, :mx, :my]


def _reference(x, y, raw_alpha, raw_ell):
    # pure-JAX reference matching the PyTorch module
    alpha = jax.nn.softplus(raw_alpha)
    ell = jax.nn.softplus(raw_ell)
    diff = x[:, :, :, None] - y[:, :, None, :]          # (n, d, mx, my)
    dist = jnp.sum(diff * diff, axis=1)                 # (n, mx, my)
    sqr_alpha = (alpha ** 2)[:, None, None]
    sqr_ell = (ell ** 2)[:, None, None]
    return sqr_alpha * jnp.exp(-0.5 * dist / sqr_ell)


if __name__ == "__main__":
    key = jax.random.PRNGKey(0)

    def _check(n, d, mx, my, tag):
        k = jax.random.fold_in(key, tag)
        kx, ky = jax.random.split(k)
        x = jax.random.normal(kx, (n, d, mx), dtype=jnp.float32)
        y = jax.random.normal(ky, (n, d, my), dtype=jnp.float32)
        # deterministic params: raw = inv_softplus(positive values)
        raw_alpha = _inv_softplus(jnp.linspace(0.5, 2.0, n, dtype=jnp.float32))
        raw_ell = _inv_softplus(jnp.linspace(0.8, 1.5, n, dtype=jnp.float32))

        out = jax.block_until_ready(quadexp_forward(x, y, raw_alpha, raw_ell))
        ref = _reference(x, y, raw_alpha, raw_ell)
        assert out.shape == (n, mx, my)
        assert jnp.allclose(out, ref, atol=1e-5, rtol=1e-5), (
            float(jnp.max(jnp.abs(out - ref))))

    _check(4, 3, 16, 16, 0)     # toy mgplvm sizes: n folded into one grid step
    _check(3, 5, 40, 200, 1)    # exercises mx/my padding + lane-dense tiles

    print("KERNEL_OK")
</pallas_src>

<mosaic_0001>
module attributes {stable_mosaic.version = 11 : i64} {
  func.func @_quadexp_kernel_vpu(%arg0: i32, %arg1: i32, %arg2: i32, %arg3: memref<4xf32, #tpu.memory_space<smem>>, %arg4: memref<4xf32, #tpu.memory_space<smem>>, %arg5: memref<4x16x3xf32, #tpu.memory_space<vmem>>, %arg6: memref<4x3x128xf32, #tpu.memory_space<vmem>>, %arg7: memref<4x16x128xf32, #tpu.memory_space<vmem>>) attributes {dimension_semantics = [#tpu.dimension_semantics<parallel>, #tpu.dimension_semantics<parallel>, #tpu.dimension_semantics<parallel>], iteration_bounds = array<i64: 1, 1, 1>, scalar_prefetch = 0 : i64, scratch_operands = 0 : i64, tpu.core_type = #tpu.core_type<tc>, window_params = [{transform_indices = @transform_0, window_bounds = array<i64: 4>}, {transform_indices = @transform_1, window_bounds = array<i64: 4>}, {transform_indices = @transform_2, window_bounds = array<i64: 4, 16, 3>}, {transform_indices = @transform_3, window_bounds = array<i64: 4, 3, 128>}, {transform_indices = @transform_4, window_bounds = array<i64: 4, 16, 128>}]} {
    %c0 = arith.constant 0 : index
    %c0_0 = arith.constant 0 : index
    %c0_1 = arith.constant 0 : index
    %0 = vector.load %arg5[%c0, %c0_0, %c0_1] : memref<4x16x3xf32, #tpu.memory_space<vmem>>, vector<1x16x3xf32>
    %1 = vector.shape_cast %0 : vector<1x16x3xf32> to vector<16x3xf32>
    %c0_2 = arith.constant 0 : index
    %c0_3 = arith.constant 0 : index
    %c0_4 = arith.constant 0 : index
    %2 = vector.load %arg6[%c0_2, %c0_3, %c0_4] : memref<4x3x128xf32, #tpu.memory_space<vmem>>, vector<1x3x128xf32>
    %3 = vector.shape_cast %2 : vector<1x3x128xf32> to vector<3x128xf32>
    %cst = arith.constant 0.000000e+00 : f32
    %4 = vector.broadcast %cst : f32 to vector<16x128xf32>
    %5 = vector.extract_strided_slice %1 {offsets = [0, 0], sizes = [16, 1], strides = [1, 1]} : vector<16x3xf32> to vector<16x1xf32>
    %6 = vector.extract_strided_slice %3 {offsets = [0, 0], sizes = [1, 128], strides = [1, 1]} : vector<3x128xf32> to vector<1x128xf32>
    %7 = vector.broadcast %5 : vector<16x1xf32> to vector<16x128xf32>
    %8 = vector.broadcast %6 : vector<1x128xf32> to vector<16x128xf32>
    %9 = arith.subf %7, %8 : vector<16x128xf32>
    %10 = arith.mulf %9, %9 : vector<16x128xf32>
    %11 = arith.addf %4, %10 : vector<16x128xf32>
    %12 = vector.extract_strided_slice %1 {offsets = [0, 1], sizes = [16, 1], strides = [1, 1]} : vector<16x3xf32> to vector<16x1xf32>
    %13 = vector.extract_strided_slice %3 {offsets = [1, 0], sizes = [1, 128], strides = [1, 1]} : vector<3x128xf32> to vector<1x128xf32>
    %14 = vector.broadcast %12 : vector<16x1xf32> to vector<16x128xf32>
    %15 = vector.broadcast %13 : vector<1x128xf32> to vector<16x128xf32>
    %16 = arith.subf %14, %15 : vector<16x128xf32>
    %17 = arith.mulf %16, %16 : vector<16x128xf32>
    %18 = arith.addf %11, %17 : vector<16x128xf32>
    %19 = vector.extract_strided_slice %1 {offsets = [0, 2], sizes = [16, 1], strides = [1, 1]} : vector<16x3xf32> to vector<16x1xf32>
    %20 = vector.extract_strided_slice %3 {offsets = [2, 0], sizes = [1, 128], strides = [1, 1]} : vector<3x128xf32> to vector<1x128xf32>
    %21 = vector.broadcast %19 : vector<16x1xf32> to vector<16x128xf32>
    %22 = vector.broadcast %20 : vector<1x128xf32> to vector<16x128xf32>
    %23 = arith.subf %21, %22 : vector<16x128xf32>
    %24 = arith.mulf %23, %23 : vector<16x128xf32>
    %25 = arith.addf %18, %24 : vector<16x128xf32>
    %c4_i32 = arith.constant 4 : i32
    %26 = arith.muli %arg0, %c4_i32 : i32
    %c0_i32 = arith.constant 0 : i32
    %27 = arith.addi %26, %c0_i32 : i32
    %28 = arith.index_cast %27 : i32 to index
    %29 = memref.load %arg3[%28] : memref<4xf32, #tpu.memory_space<smem>>
    %30 = arith.index_cast %27 : i32 to index
    %31 = memref.load %arg4[%30] : memref<4xf32, #tpu.memory_space<smem>>
    %32 = vector.broadcast %31 : f32 to vector<16x128xf32>
    %33 = arith.mulf %25, %32 : vector<16x128xf32>
    %34 = math.exp %33 : vector<16x128xf32>
    %35 = vector.broadcast %29 : f32 to vector<16x128xf32>
    %36 = arith.mulf %35, %34 : vector<16x128xf32>
    %c0_5 = arith.constant 0 : index
    %c0_6 = arith.constant 0 : index
    %c0_7 = arith.constant 0 : index
    %37 = vector.load %arg7[%c0_5, %c0_6, %c0_7] : memref<4x16x128xf32, #tpu.memory_space<vmem>>, vector<1x16x128xf32>
    %38 = vector.shape_cast %37 : vector<1x16x128xf32> to vector<16x128xf32>
    %39 = vector.shape_cast %36 : vector<16x128xf32> to vector<1x16x128xf32>
    tpu.vector_store %arg7[%c0_5, %c0_6, %c0_7], %39 {strides = array<i32>} : memref<4x16x128xf32, #tpu.memory_space<vmem>>, vector<1x16x128xf32>,
    %c1 = arith.constant 1 : index
    %c0_8 = arith.constant 0 : index
    %c0_9 = arith.constant 0 : index
    %40 = vector.load %arg5[%c1, %c0_8, %c0_9] : memref<4x16x3xf32, #tpu.memory_space<vmem>>, vector<1x16x3xf32>
    %41 = vector.shape_cast %40 : vector<1x16x3xf32> to vector<16x3xf32>
    %c1_10 = arith.constant 1 : index
    %c0_11 = arith.constant 0 : index
    %c0_12 = arith.constant 0 : index
    %42 = vector.load %arg6[%c1_10, %c0_11, %c0_12] : memref<4x3x128xf32, #tpu.memory_space<vmem>>, vector<1x3x128xf32>
    %43 = vector.shape_cast %42 : vector<1x3x128xf32> to vector<3x128xf32>
    %cst_13 = arith.constant 0.000000e+00 : f32
    %44 = vector.broadcast %cst_13 : f32 to vector<16x128xf32>
    %45 = vector.extract_strided_slice %41 {offsets = [0, 0], sizes = [16, 1], strides = [1, 1]} : vector<16x3xf32> to vector<16x1xf32>
    %46 = vector.extract_strided_slice %43 {offsets = [0, 0], sizes = [1, 128], strides = [1, 1]} : vector<3x128xf32> to vector<1x128xf32>
    %47 = vector.broadcast %45 : vector<16x1xf32> to vector<16x128xf32>
    %48 = vector.broadcast %46 : vector<1x128xf32> to vector<16x128xf32>
    %49 = arith.subf %47, %48 : vector<16x128xf32>
    %50 = arith.mulf %49, %49 : vector<16x128xf32>
    %51 = arith.addf %44, %50 : vector<16x128xf32>
    %52 = vector.extract_strided_slice %41 {offsets = [0, 1], sizes = [16, 1], strides = [1, 1]} : vector<16x3xf32> to vector<16x1xf32>
    %53 = vector.extract_strided_slice %43 {offsets = [1, 0], sizes = [1, 128], strides = [1, 1]} : vector<3x128xf32> to vector<1x128xf32>
    %54 = vector.broadcast %52 : vector<16x1xf32> to vector<16x128xf32>
    %55 = vector.broadcast %53 : vector<1x128xf32> to vector<16x128xf32>
    %56 = arith.subf %54, %55 : vector<16x128xf32>
    %57 = arith.mulf %56, %56 : vector<16x128xf32>
    %58 = arith.addf %51, %57 : vector<16x128xf32>
    %59 = vector.extract_strided_slice %41 {offsets = [0, 2], sizes = [16, 1], strides = [1, 1]} : vector<16x3xf32> to vector<16x1xf32>
    %60 = vector.extract_strided_slice %43 {offsets = [2, 0], sizes = [1, 128], strides = [1, 1]} : vector<3x128xf32> to vector<1x128xf32>
    %61 = vector.broadcast %59 : vector<16x1xf32> to vector<16x128xf32>
    %62 = vector.broadcast %60 : vector<1x128xf32> to vector<16x128xf32>
    %63 = arith.subf %61, %62 : vector<16x128xf32>
    %64 = arith.mulf %63, %63 : vector<16x128xf32>
    %65 = arith.addf %58, %64 : vector<16x128xf32>
    %c4_i32_14 = arith.constant 4 : i32
    %66 = arith.muli %arg0, %c4_i32_14 : i32
    %c1_i32 = arith.constant 1 : i32
    %67 = arith.addi %66, %c1_i32 : i32
    %68 = arith.index_cast %67 : i32 to index
    %69 = memref.load %arg3[%68] : memref<4xf32, #tpu.memory_space<smem>>
    %70 = arith.index_cast %67 : i32 to index
    %71 = memref.load %arg4[%70] : memref<4xf32, #tpu.memory_space<smem>>
    %72 = vector.broadcast %71 : f32 to vector<16x128xf32>
    %73 = arith.mulf %65, %72 : vector<16x128xf32>
    %74 = math.exp %73 : vector<16x128xf32>
    %75 = vector.broadcast %69 : f32 to vector<16x128xf32>
    %76 = arith.mulf %75, %74 : vector<16x128xf32>
    %c1_15 = arith.constant 1 : index
    %c0_16 = arith.constant 0 : index
    %c0_17 = arith.constant 0 : index
    %77 = vector.load %arg7[%c1_15, %c0_16, %c0_17] : memref<4x16x128xf32, #tpu.memory_space<vmem>>, vector<1x16x128xf32>
    %78 = vector.shape_cast %77 : vector<1x16x128xf32> to vector<16x128xf32>
    %79 = vector.shape_cast %76 : vector<16x128xf32> to vector<1x16x128xf32>
    tpu.vector_store %arg7[%c1_15, %c0_16, %c0_17], %79 {strides = array<i32>} : memref<4x16x128xf32, #tpu.memory_space<vmem>>, vector<1x16x128xf32>,
    %c2 = arith.constant 2 : index
    %c0_18 = arith.constant 0 : index
    %c0_19 = arith.constant 0 : index
    %80 = vector.load %arg5[%c2, %c0_18, %c0_19] : memref<4x16x3xf32, #tpu.memory_space<vmem>>, vector<1x16x3xf32>
    %81 = vector.shape_cast %80 : vector<1x16x3xf32> to vector<16x3xf32>
    %c2_20 = arith.constant 2 : index
    %c0_21 = arith.constant 0 : index
    %c0_22 = arith.constant 0 : index
    %82 = vector.load %arg6[%c2_20, %c0_21, %c0_22] : memref<4x3x128xf32, #tpu.memory_space<vmem>>, vector<1x3x128xf32>
    %83 = vector.shape_cast %82 : vector<1x3x128xf32> to vector<3x128xf32>
    %cst_23 = arith.constant 0.000000e+00 : f32
    %84 = vector.broadcast %cst_23 : f32 to vector<16x128xf32>
    %85 = vector.extract_strided_slice %81 {offsets = [0, 0], sizes = [16, 1], strides = [1, 1]} : vector<16x3xf32> to vector<16x1xf32>
    %86 = vector.extract_strided_slice %83 {offsets = [0, 0], sizes = [1, 128], strides = [1, 1]} : vector<3x128xf32> to vector<1x128xf32>
    %87 = vector.broadcast %85 : vector<16x1xf32> to vector<16x128xf32>
    %88 = vector.broadcast %86 : vector<1x128xf32> to vector<16x128xf32>
    %89 = arith.subf %87, %88 : vector<16x128xf32>
    %90 = arith.mulf %89, %89 : vector<16x128xf32>
    %91 = arith.addf %84, %90 : vector<16x128xf32>
    %92 = vector.extract_strided_slice %81 {offsets = [0, 1], sizes = [16, 1], strides = [1, 1]} : vector<16x3xf32> to vector<16x1xf32>
    %93 = vector.extract_strided_slice %83 {offsets = [1, 0], sizes = [1, 128], strides = [1, 1]} : vector<3x128xf32> to vector<1x128xf32>
    %94 = vector.broadcast %92 : vector<16x1xf32> to vector<16x128xf32>
    %95 = vector.broadcast %93 : vector<1x128xf32> to vector<16x128xf32>
    %96 = arith.subf %94, %95 : vector<16x128xf32>
    %97 = arith.mulf %96, %96 : vector<16x128xf32>
    %98 = arith.addf %91, %97 : vector<16x128xf32>
    %99 = vector.extract_strided_slice %81 {offsets = [0, 2], sizes = [16, 1], strides = [1, 1]} : vector<16x3xf32> to vector<16x1xf32>
    %100 = vector.extract_strided_slice %83 {offsets = [2, 0], sizes = [1, 128], strides = [1, 1]} : vector<3x128xf32> to vector<1x128xf32>
    %101 = vector.broadcast %99 : vector<16x1xf32> to vector<16x128xf32>
    %102 = vector.broadcast %100 : vector<1x128xf32> to vector<16x128xf32>
    %103 = arith.subf %101, %102 : vector<16x128xf32>
    %104 = arith.mulf %103, %103 : vector<16x128xf32>
    %105 = arith.addf %98, %104 : vector<16x128xf32>
    %c4_i32_24 = arith.constant 4 : i32
    %106 = arith.muli %arg0, %c4_i32_24 : i32
    %c2_i32 = arith.constant 2 : i32
    %107 = arith.addi %106, %c2_i32 : i32
    %108 = arith.index_cast %107 : i32 to index
    %109 = memref.load %arg3[%108] : memref<4xf32, #tpu.memory_space<smem>>
    %110 = arith.index_cast %107 : i32 to index
    %111 = memref.load %arg4[%110] : memref<4xf32, #tpu.memory_space<smem>>
    %112 = vector.broadcast %111 : f32 to vector<16x128xf32>
    %113 = arith.mulf %105, %112 : vector<16x128xf32>
    %114 = math.exp %113 : vector<16x128xf32>
    %115 = vector.broadcast %109 : f32 to vector<16x128xf32>
    %116 = arith.mulf %115, %114 : vector<16x128xf32>
    %c2_25 = arith.constant 2 : index
    %c0_26 = arith.constant 0 : index
    %c0_27 = arith.constant 0 : index
    %117 = vector.load %arg7[%c2_25, %c0_26, %c0_27] : memref<4x16x128xf32, #tpu.memory_space<vmem>>, vector<1x16x128xf32>
    %118 = vector.shape_cast %117 : vector<1x16x128xf32> to vector<16x128xf32>
    %119 = vector.shape_cast %116 : vector<16x128xf32> to vector<1x16x128xf32>
    tpu.vector_store %arg7[%c2_25, %c0_26, %c0_27], %119 {strides = array<i32>} : memref<4x16x128xf32, #tpu.memory_space<vmem>>, vector<1x16x128xf32>,
    %c3 = arith.constant 3 : index
    %c0_28 = arith.constant 0 : index
    %c0_29 = arith.constant 0 : index
    %120 = vector.load %arg5[%c3, %c0_28, %c0_29] : memref<4x16x3xf32, #tpu.memory_space<vmem>>, vector<1x16x3xf32>
    %121 = vector.shape_cast %120 : vector<1x16x3xf32> to vector<16x3xf32>
    %c3_30 = arith.constant 3 : index
    %c0_31 = arith.constant 0 : index
    %c0_32 = arith.constant 0 : index
    %122 = vector.load %arg6[%c3_30, %c0_31, %c0_32] : memref<4x3x128xf32, #tpu.memory_space<vmem>>, vector<1x3x128xf32>
    %123 = vector.shape_cast %122 : vector<1x3x128xf32> to vector<3x128xf32>
    %cst_33 = arith.constant 0.000000e+00 : f32
    %124 = vector.broadcast %cst_33 : f32 to vector<16x128xf32>
    %125 = vector.extract_strided_slice %121 {offsets = [0, 0], sizes = [16, 1], strides = [1, 1]} : vector<16x3xf32> to vector<16x1xf32>
    %126 = vector.extract_strided_slice %123 {offsets = [0, 0], sizes = [1, 128], strides = [1, 1]} : vector<3x128xf32> to vector<1x128xf32>
    %127 = vector.broadcast %125 : vector<16x1xf32> to vector<16x128xf32>
    %128 = vector.broadcast %126 : vector<1x128xf32> to vector<16x128xf32>
    %129 = arith.subf %127, %128 : vector<16x128xf32>
    %130 = arith.mulf %129, %129 : vector<16x128xf32>
    %131 = arith.addf %124, %130 : vector<16x128xf32>
    %132 = vector.extract_strided_slice %121 {offsets = [0, 1], sizes = [16, 1], strides = [1, 1]} : vector<16x3xf32> to vector<16x1xf32>
    %133 = vector.extract_strided_slice %123 {offsets = [1, 0], sizes = [1, 128], strides = [1, 1]} : vector<3x128xf32> to vector<1x128xf32>
    %134 = vector.broadcast %132 : vector<16x1xf32> to vector<16x128xf32>
    %135 = vector.broadcast %133 : vector<1x128xf32> to vector<16x128xf32>
    %136 = arith.subf %134, %135 : vector<16x128xf32>
    %137 = arith.mulf %136, %136 : vector<16x128xf32>
    %138 = arith.addf %131, %137 : vector<16x128xf32>
    %139 = vector.extract_strided_slice %121 {offsets = [0, 2], sizes = [16, 1], strides = [1, 1]} : vector<16x3xf32> to vector<16x1xf32>
    %140 = vector.extract_strided_slice %123 {offsets = [2, 0], sizes = [1, 128], strides = [1, 1]} : vector<3x128xf32> to vector<1x128xf32>
    %141 = vector.broadcast %139 : vector<16x1xf32> to vector<16x128xf32>
    %142 = vector.broadcast %140 : vector<1x128xf32> to vector<16x128xf32>
    %143 = arith.subf %141, %142 : vector<16x128xf32>
    %144 = arith.mulf %143, %143 : vector<16x128xf32>
    %145 = arith.addf %138, %144 : vector<16x128xf32>
    %c4_i32_34 = arith.constant 4 : i32
    %146 = arith.muli %arg0, %c4_i32_34 : i32
    %c3_i32 = arith.constant 3 : i32
    %147 = arith.addi %146, %c3_i32 : i32
    %148 = arith.index_cast %147 : i32 to index
    %149 = memref.load %arg3[%148] : memref<4xf32, #tpu.memory_space<smem>>
    %150 = arith.index_cast %147 : i32 to index
    %151 = memref.load %arg4[%150] : memref<4xf32, #tpu.memory_space<smem>>
    %152 = vector.broadcast %151 : f32 to vector<16x128xf32>
    %153 = arith.mulf %145, %152 : vector<16x128xf32>
    %154 = math.exp %153 : vector<16x128xf32>
    %155 = vector.broadcast %149 : f32 to vector<16x128xf32>
    %156 = arith.mulf %155, %154 : vector<16x128xf32>
    %c3_35 = arith.constant 3 : index
    %c0_36 = arith.constant 0 : index
    %c0_37 = arith.constant 0 : index
    %157 = vector.load %arg7[%c3_35, %c0_36, %c0_37] : memref<4x16x128xf32, #tpu.memory_space<vmem>>, vector<1x16x128xf32>
    %158 = vector.shape_cast %157 : vector<1x16x128xf32> to vector<16x128xf32>
    %159 = vector.shape_cast %156 : vector<16x128xf32> to vector<1x16x128xf32>
    tpu.vector_store %arg7[%c3_35, %c0_36, %c0_37], %159 {strides = array<i32>} : memref<4x16x128xf32, #tpu.memory_space<vmem>>, vector<1x16x128xf32>,
    return
  }
  func.func @transform_0(%arg0: i32, %arg1: i32, %arg2: i32) -> i32 {
    %c0_i32 = arith.constant 0 : i32
    %c0_i32_0 = arith.constant 0 : i32
    return %c0_i32 : i32
  }
  func.func @transform_1(%arg0: i32, %arg1: i32, %arg2: i32) -> i32 {
    %c0_i32 = arith.constant 0 : i32
    %c0_i32_0 = arith.constant 0 : i32
    return %c0_i32 : i32
  }
  func.func @transform_2(%arg0: i32, %arg1: i32, %arg2: i32) -> (i32, i32, i32) {
    %c0_i32 = arith.constant 0 : i32
    %c0_i32_0 = arith.constant 0 : i32
    return %arg0, %arg1, %c0_i32 : i32, i32, i32
  }
  func.func @transform_3(%arg0: i32, %arg1: i32, %arg2: i32) -> (i32, i32, i32) {
    %c0_i32 = arith.constant 0 : i32
    %c0_i32_0 = arith.constant 0 : i32
    return %arg0, %c0_i32, %arg2 : i32, i32, i32
  }
  func.func @transform_4(%arg0: i32, %arg1: i32, %arg2: i32) -> (i32, i32, i32) {
    %c0_i32 = arith.constant 0 : i32
    return %arg0, %arg1, %arg2 : i32, i32, i32
  }
}

</mosaic_0001>

<bundles_post_ra>
// kernel: tpu_custom_call.1
= control target key start
LH: loop header
LB: loop body
LE: loop exit
PB: predicated region body
PF: predicated region fallthrough
CT: control target
= control target key end

     0   :  { %9 = vsyncpa [#allocation4], 0  ;;  %s635_s0 = inlined_call_operand.vmem [shape: f32[4], index: 0, kind: input, shape index: {}]   ;;  %s636_s1 = inlined_call_operand.vmem [shape: f32[4], index: 1, kind: input, shape index: {}]   ;;  %s637_s2 = inlined_call_operand.vmem [shape: f32[4,16,3], index: 2, kind: input, shape index: {}]   ;;  %s638_s3 = inlined_call_operand.vmem [shape: f32[4,3,128], index: 3, kind: input, shape index: {}]   ;;  %s639_s4 = inlined_call_operand.hbm [shape: f32[4,16,128], index: 4, kind: output, shape index: {}]  }
   0x1   :  { %10 = vsyncpa [#allocation6], 0 }
   0x2   :  { %11 = vsyncpa [#allocation3], 0  ;;  %s18_s17 = sshll.u32 %s635_s0, 4  ;;  %s28_s20 = sshll.u32 %s636_s1, 4  ;;  %s19_s17 = int_to_ptr.vmem [resolvable:$true] %s18_s17  ;;  %s29_s20 = int_to_ptr.vmem [resolvable:$true] %s28_s20 }
   0x3   :  { %s416_s21 = scalar_lea.vmem %s19_s17, 16  ;;  %p421_p1 = scmp.lt.s32.totalorder %s19_s17, %s19_s17 }
   0x4   :  { %p417_p0 = scmp.ne.s32.totalorder %s19_s17, %s416_s21  ;;  %p422_p2 = scmp.lt.s32.totalorder %s416_s21, %s416_s21 }
   0x6   :  { %p423_p3 = por %p422_p2, %p421_p1 }
   0x8   :  { %p424_p4 = pnand %p423_p3, %p417_p0 }
   0xa   :  { %427 = shalt.err (!%p424_p4)
}
   0xb   :  { %s468_s22 = smov [#allocation2]   ;;  %s428_s23 = scalar_lea.vmem %s29_s20, 16 }
   0xc   :  { %21 = dma.vmem_to_smem %s19_s17, 16, %s468_s22, [#allocation4]  }
   0xd   :  { %p429_p5 = scmp.ne.s32.totalorder %s29_s20, %s428_s23  ;;  %p433_p6 = scmp.lt.s32.totalorder %s29_s20, %s29_s20 }
   0xe   :  { %p434_p7 = scmp.lt.s32.totalorder %s428_s23, %s428_s23 }
  0x10   :  { %p435_p8 = por %p434_p7, %p433_p6 }
  0x12   :  { %p436_p9 = pnand %p435_p8, %p429_p5 }
  0x14   :  { %439 = shalt.err (!%p436_p9)
}
  0x15   :  { %s469_s0 = smov [#allocation5]  }
  0x16   :  { %31 = dma.vmem_to_smem %s29_s20, 16, %s469_s0, [#allocation6]  }
  0x17   :  { %462 = dma.done.wait [#allocation4], 16  }
  0x18   :  { %463 = vsyncadd [#allocation4], 4294967280 }
  0x19   :  { %464 = dma.done.wait [#allocation6], 16  }
  0x1a   :  { %465 = vsyncadd [#allocation6], 4294967280 }
  0x1b   :  { %42 = sfence }
  0x1c   :  { %v43_v0 = vld [vmem:[%s637_s2] sm:$0xff]  ;;  %v470_v1 = vmov 1   ;;  %v471_v2 = vmov 0   ;;  %v44_v3 = vld [vmem:[%s637_s2 + $0x8] sm:$0xff]  ;;  %v366_v4 = vld [vmem:[%s637_s2 + $0x10] sm:$0xff]  ;;  %v472_v9 = vmov 2   ;;  %v56_v17 = vlaneseq }
  0x1d   :  { %390 = vset.pattern.permute.xlu1 %v470_v1  ;;  %389 = vset.pattern.permute.xlu0 %v471_v2  ;;  %v367_v5 = vld [vmem:[%s637_s2 + $0x18] sm:$0xff]  ;;  %v372_v6 = vld [vmem:[%s637_s2 + $0x28] sm:$0xff]  ;;  %v376_v7 = vld [vmem:[%s637_s2 + $0x30] sm:$0xff]  ;;  %s551_s16 = sld [smem:[#allocation5]]  ;;  %s564_s19 = sld [smem:[#allocation5 + $0x2]] }
  0x1e   :  { %67 = vperm.xlu1 %390, %v43_v0   ;;  %48 = vperm.xlu0 %389, %v43_v0   ;;  %v371_v8 = vld [vmem:[%s637_s2 + $0x20] sm:$0xff]  ;;  %v377_v10 = vld [vmem:[%s637_s2 + $0x38] sm:$0xff]  ;;  %v57_v20 = vshrl.u32 %v56_v17, 7  ;;  %v373_v30 = vld [vmem:[%s638_s3 + $0x8] sm:$0x7]  ;;  %s572_s20 = sld [smem:[#allocation5 + $0x3]] }
  0x1f   :  { %v45_v25 = vld [vmem:[%s638_s3] sm:$0x7]  ;;  %v378_v38 = vld [vmem:[%s638_s3 + $0xc] sm:$0x7]  ;;  %v368_v61 = vld [vmem:[%s638_s3 + $0x4] sm:$0x7] }
  0x20   :  { %v76_v22 = vsub.s32 1, %v57_v20  ;;  %v58_v23 = vsub.s32 0, %v57_v20  ;;  %v544_v29 = vsub.s32 2, %v57_v20  ;;  %s589_s3 = sld [smem:[#allocation2]]  ;;  %s595_s23 = sld [smem:[#allocation5 + $0x1]] }
  0x21   :  { %s599_s0 = sld [smem:[#allocation2 + $0x2]]  ;;  %s607_s1 = sld [smem:[#allocation2 + $0x3]] }
  0x22   :  { %71 = vperm.xlu1 %390, %v44_v3   ;;  %53 = vperm.xlu0 %389, %v44_v3   ;;  %v77_v27 = vrot.slane %v45_v25, %v76_v22  ;;  %v59_v28 = vrot.slane %v45_v25, %v58_v23  ;;  %v549_v34 = vrot.slane %v373_v30, %v76_v22  ;;  %s369_s24 = sld [smem:[#allocation2 + $0x1]]  ;;  %s473_s25 = smov [#allocation7]  }
  0x23   :  { %v553_v36 = vrot.slane %v373_v30, %v58_v23  ;;  %v95_v37 = vrot.slane %v45_v25, %v544_v29  ;;  %v562_v43 = vrot.slane %v378_v38, %v76_v22  ;;  %v566_v45 = vrot.slane %v378_v38, %v58_v23  ;;  %s353_s26 = sshll.u32 %s473_s25, 4  ;;  %s354_s26 = int_to_ptr.vmem [resolvable:$true] %s353_s26 }
  0x24   :  { %v570_v48 = vrot.slane %v373_v30, %v544_v29  ;;  %v105_v54 = vstv %s551_s16  ;;  %v579_v56 = vrot.slane %v378_v38, %v544_v29  ;;  %v335_v17 = vstv %s572_s20  ;;  %s440_s27 = scalar_lea.vmem %s354_s26, 1024  ;;  %p445_p11 = scmp.lt.s32.totalorder %s354_s26, %s354_s26 }
  0x25   :  { %p441_p10 = scmp.ne.s32.totalorder %s354_s26, %s440_s27  ;;  %p446_p12 = scmp.lt.s32.totalorder %s440_s27, %s440_s27 }
  0x26   :  { %391 = vset.pattern.permute.xlu1 %v471_v2  ;;  %124 = vperm.xlu0 %389, %v366_v4  }
  0x27   :  { %129 = vperm.xlu1 %391, %v367_v5   ;;  %p447_p13 = por %p446_p12, %p445_p11 }
  0x29   :  { %p448_p0 = pnand %p447_p13, %p441_p10 }
  0x2a   :  { %206 = vperm.xlu0 %389, %v372_v6  }
  0x2b   :  { %392 = vset.pattern.permute.xlu1 %v470_v1 }
  0x2c   :  { %147 = vperm.xlu1 %392, %v367_v5  }
  0x2e   :  { %278 = vperm.xlu0 %389, %v376_v7  }
  0x30   :  { %393 = vset.pattern.permute.xlu1 %v471_v2 }
  0x31   :  { %201 = vperm.xlu1 %393, %v371_v8  }
  0x32   :  { %395 = vset.pattern.permute.xlu0 %v470_v1 }
  0x33   :  { %143 = vperm.xlu0 %395, %v366_v4  }
  0x35   :  { %394 = vset.pattern.permute.xlu1 %v470_v1 }
  0x36   :  { %220 = vperm.xlu1 %394, %v371_v8  }
  0x37   :  { %297 = vperm.xlu0 %395, %v376_v7  }
  0x3a   :  { %224 = vperm.xlu1 %394, %v372_v6  }
  0x3b   :  { %399 = vset.pattern.permute.xlu0 %v472_v9 }
  0x3c   :  { %89 = vperm.xlu0 %399, %v44_v3  }
  0x3e   :  { %396 = vset.pattern.permute.xlu1 %v471_v2 }
  0x3f   :  { %283 = vperm.xlu1 %396, %v377_v10  }
  0x40   :  { %238 = vperm.xlu0 %399, %v371_v8  }
  0x43   :  { %397 = vset.pattern.permute.xlu1 %v470_v1 }
  0x44   :  { %301 = vperm.xlu1 %397, %v377_v10   ;;  %315 = vperm.xlu0 %399, %v376_v7  }
  0x48   :  { %398 = vset.pattern.permute.xlu1 %v472_v9 }
  0x49   :  { %85 = vperm.xlu1 %398, %v43_v0  }
  0x4d   :  { %161 = vperm.xlu1 %398, %v366_v4   ;;  %v258_v4 = vstv %s564_s19 }
  0x51   :  { %165 = vperm.xlu1 %398, %v367_v5  }
  0x55   :  { %242 = vperm.xlu1 %398, %v372_v6  }
  0x59   :  { %319 = vperm.xlu1 %398, %v377_v10  }
  0x9d   :  { %v68_v11 = vpop.permute.xlu1 %67  ;;  %v49_v12 = vpop.permute.xlu0 %48 }
  0x9e   :  { %v78_v2 = vsub.f32 %v68_v11, %v77_v27  ;;  %v60_v3 = vsub.f32 %v49_v12, %v59_v28 }
  0xa0   :  { %v80_v12 = vmul.f32 %v78_v2, %v78_v2 }
  0xa1   :  { %v72_v13 = vpop.permute.xlu1 %71  ;;  %v54_v14 = vpop.permute.xlu0 %53 }
  0xa2   :  { %v79_v32 = vsub.f32 %v72_v13, %v77_v27  ;;  %v61_v33 = vsub.f32 %v54_v14, %v59_v28  ;;  %v135_v13 = vrot.slane %v368_v61, %v58_v23  ;;  %v153_v14 = vrot.slane %v368_v61, %v76_v22 }
  0xa3   :  { %v171_v23 = vrot.slane %v368_v61, %v544_v29 }
  0xa4   :  { %v81_v40 = vmul.f32 %v79_v32, %v79_v32  ;;  %v63_v41 = vmul.f32 %v61_v33, %v61_v33 }
  0xa5   :  { %v531_v15 = vpop.permute.xlu0 %124 }
  0xa6   :  { %v533_v16 = vpop.permute.xlu1 %129  ;;  %v83_v49 = vadd.f32 %v81_v40, %v63_v41  ;;  %v136_v25 = vsub.f32 %v531_v15, %v135_v13 }
  0xa7   :  { %v137_v40 = vsub.f32 %v533_v16, %v135_v13 }
  0xa8   :  { %v138_v15 = vmul.f32 %v136_v25, %v136_v25 }
  0xa9   :  { %v535_v18 = vpop.permute.xlu0 %206 }
  0xaa   :  { %v214_v16 = vsub.f32 %v535_v18, %v553_v36 }
  0xab   :  { %v537_v19 = vpop.permute.xlu1 %147 }
  0xac   :  { %v155_v32 = vsub.f32 %v537_v19, %v153_v14  ;;  %v216_v2 = vmul.f32 %v214_v16, %v214_v16 }
  0xad   :  { %v279_v21 = vpop.permute.xlu0 %278 }
  0xae   :  { %v290_v57 = vsub.f32 %v279_v21, %v566_v45  ;;  %v157_v29 = vmul.f32 %v155_v32, %v155_v32 }
  0xb0   :  { %v202_v24 = vpop.permute.xlu1 %201  ;;  %v292_v7 = vmul.f32 %v290_v57, %v290_v57 }
  0xb1   :  { %v213_v46 = vsub.f32 %v202_v24, %v553_v36  ;;  %v62_v24 = vmul.f32 %v60_v3, %v60_v3 }
  0xb2   :  { %v542_v26 = vpop.permute.xlu0 %143 }
  0xb3   :  { %v215_v58 = vmul.f32 %v213_v46, %v213_v46  ;;  %v154_v27 = vsub.f32 %v542_v26, %v153_v14  ;;  %v112_v46 = vstv %s589_s3 }
  0xb5   :  { %v221_v31 = vpop.permute.xlu1 %220  ;;  %v156_v38 = vmul.f32 %v154_v27, %v154_v27 }
  0xb6   :  { %v298_v35 = vpop.permute.xlu0 %297  ;;  %v231_v42 = vsub.f32 %v221_v31, %v549_v34 }
  0xb7   :  { %v308_v51 = vsub.f32 %v298_v35, %v562_v43  ;;  %v82_v35 = vadd.f32 %v80_v12, %v62_v24 }
  0xb8   :  { %v233_v50 = vmul.f32 %v231_v42, %v231_v42 }
  0xb9   :  { %v559_v39 = vpop.permute.xlu1 %224  ;;  %v310_v63 = vmul.f32 %v308_v51, %v308_v51 }
  0xba   :  { %v235_v62 = vadd.f32 %v233_v50, %v215_v58  ;;  %v232_v19 = vsub.f32 %v559_v39, %v549_v34 }
  0xbb   :  { %v90_v44 = vpop.permute.xlu0 %89  ;;  %v312_v20 = vadd.f32 %v310_v63, %v292_v7 }
  0xbc   :  { %v97_v47 = vsub.f32 %v90_v44, %v95_v37  ;;  %v234_v39 = vmul.f32 %v232_v19, %v232_v19 }
  0xbe   :  { %v99_v52 = vmul.f32 %v97_v47, %v97_v47  ;;  %v575_v53 = vpop.permute.xlu1 %283  ;;  %v158_v47 = vadd.f32 %v156_v38, %v138_v15 }
  0xbf   :  { %v239_v55 = vpop.permute.xlu0 %238  ;;  %v291_v18 = vsub.f32 %v575_v53, %v566_v45 }
  0xc0   :  { %v101_v59 = vadd.f32 %v99_v52, %v83_v49  ;;  %v249_v60 = vsub.f32 %v239_v55, %v570_v48  ;;  %v139_v52 = vmul.f32 %v137_v40, %v137_v40  ;;  %v181_v55 = vstv %s595_s23 }
  0xc2   :  { %v107_v0 = vmul.f32 %v105_v54, %v101_v59  ;;  %v251_v1 = vmul.f32 %v249_v60, %v249_v60  ;;  %v159_v34 = vadd.f32 %v157_v29, %v139_v52 }
  0xc3   :  { %v302_v5 = vpop.permute.xlu1 %301  ;;  %v316_v6 = vpop.permute.xlu0 %315 }
  0xc4   :  { %v110_v8 = vmul.f32 1.442695, %v107_v0  ;;  %v253_v9 = vadd.f32 %v251_v1, %v235_v62  ;;  %v326_v10 = vsub.f32 %v316_v6, %v579_v56  ;;  %v265_v62 = vstv %s599_s0 }
  0xc5   :  { %v309_v63 = vsub.f32 %v302_v5, %v562_v43 }
  0xc6   :  { %400 = vpow2.f32 %v110_v8  ;;  %v259_v21 = vmul.f32 %v258_v4, %v253_v9  ;;  %v328_v11 = vmul.f32 %v326_v10, %v326_v10  ;;  %v236_v9 = vadd.f32 %v234_v39, %v216_v2 }
  0xc7   :  { %v342_v10 = vstv %s607_s1  ;;  %v311_v13 = vmul.f32 %v309_v63, %v309_v63 }
  0xc8   :  { %v261_v28 = vmul.f32 1.442695, %v259_v21  ;;  %v330_v30 = vadd.f32 %v328_v11, %v312_v20  ;;  %v86_v31 = vpop.permute.xlu1 %85  ;;  %v293_v20 = vmul.f32 %v291_v18, %v291_v18 }
  0xc9   :  { %v96_v22 = vsub.f32 %v86_v31, %v95_v37 }
  0xca   :  { %402 = vpow2.f32 %v261_v28  ;;  %v336_v33 = vmul.f32 %v335_v17, %v330_v30  ;;  %v313_v24 = vadd.f32 %v311_v13, %v293_v20 }
  0xcb   :  { %v98_v26 = vmul.f32 %v96_v22, %v96_v22  ;;  %v188_v22 = vstv %s369_s24 }
  0xcc   :  { %v338_v41 = vmul.f32 1.442695, %v336_v33  ;;  %v162_v42 = vpop.permute.xlu1 %161 }
  0xcd   :  { %v100_v37 = vadd.f32 %v98_v26, %v82_v35  ;;  %v172_v44 = vsub.f32 %v162_v42, %v171_v23 }
  0xce   :  { %404 = vpow2.f32 %v338_v41 }
  0xcf   :  { %v106_v49 = vmul.f32 %v105_v54, %v100_v37  ;;  %v174_v50 = vmul.f32 %v172_v44, %v172_v44 }
  0xd0   :  { %v401_v51 = vpop.eup %400  ;;  %v166_v57 = vpop.permute.xlu1 %165 }
  0xd1   :  { %v114_v58 = vmul.f32 %v401_v51, %v112_v46  ;;  %v108_v59 = vmul.f32 1.442695, %v106_v49  ;;  %v176_v60 = vadd.f32 %v174_v50, %v158_v47  ;;  %v173_v61 = vsub.f32 %v166_v57, %v171_v23 }
  0xd3   :  { %116 = vst [vmem:[#allocation7 + $0x8] sm:$0xff] %v114_v58  ;;  %406 = vpow2.f32 %v108_v59  ;;  %v182_v54 = vmul.f32 %v181_v55, %v176_v60  ;;  %v175_v0 = vmul.f32 %v173_v61, %v173_v61 }
  0xd4   :  { %v403_v1 = vpop.eup %402  ;;  %v243_v36 = vpop.permute.xlu1 %242 }
  0xd5   :  { %v266_v3 = vmul.f32 %v403_v1, %v265_v62  ;;  %v184_v6 = vmul.f32 1.442695, %v182_v54  ;;  %v177_v7 = vadd.f32 %v175_v0, %v159_v34  ;;  %v250_v8 = vsub.f32 %v243_v36, %v570_v48 }
  0xd7   :  { %269 = vst [vmem:[#allocation7 + $0x20] sm:$0xff] %v266_v3  ;;  %408 = vpow2.f32 %v184_v6  ;;  %v183_v43 = vmul.f32 %v181_v55, %v177_v7  ;;  %v252_v5 = vmul.f32 %v250_v8, %v250_v8 }
  0xd8   :  { %v405_v14 = vpop.eup %404  ;;  %v320_v21 = vpop.permute.xlu1 %319 }
  0xd9   :  { %v343_v45 = vmul.f32 %v405_v14, %v342_v10  ;;  %v186_v53 = vmul.f32 1.442695, %v183_v43  ;;  %v254_v11 = vadd.f32 %v252_v5, %v236_v9  ;;  %v327_v12 = vsub.f32 %v320_v21, %v579_v56 }
  0xdb   :  { %346 = vst [vmem:[#allocation7 + $0x30] sm:$0xff] %v343_v45  ;;  %410 = vpow2.f32 %v186_v53  ;;  %v260_v48 = vmul.f32 %v258_v4, %v254_v11  ;;  %v329_v25 = vmul.f32 %v327_v12, %v327_v12 }
  0xdd   :  { %v407_v27 = vpop.eup %406  ;;  %v263_v28 = vmul.f32 1.442695, %v260_v48  ;;  %v331_v30 = vadd.f32 %v329_v25, %v313_v24 }
  0xde   :  { %v113_v31 = vmul.f32 %v407_v27, %v112_v46 }
  0xdf   :  { %412 = vpow2.f32 %v263_v28  ;;  %v337_v23 = vmul.f32 %v335_v17, %v331_v30 }
  0xe0   :  { %115 = vst [vmem:[#allocation7] sm:$0xff] %v113_v31 }
  0xe1   :  { %v409_v32 = vpop.eup %408  ;;  %v340_v33 = vmul.f32 1.442695, %v337_v23 }
  0xe2   :  { %v189_v35 = vmul.f32 %v409_v32, %v188_v22 }
  0xe3   :  { %414 = vpow2.f32 %v340_v33 }
  0xe4   :  { %192 = vst [vmem:[#allocation7 + $0x10] sm:$0xff] %v189_v35 }
  0xe5   :  { %v411_v56 = vpop.eup %410 }
  0xe6   :  { %v190_v15 = vmul.f32 %v411_v56, %v188_v22 }
  0xe8   :  { %193 = vst [vmem:[#allocation7 + $0x18] sm:$0xff] %v190_v15 }
  0xe9   :  { %v413_v38 = vpop.eup %412 }
  0xea   :  { %v267_v4 = vmul.f32 %v413_v38, %v265_v62 }
  0xec   :  { %270 = vst [vmem:[#allocation7 + $0x28] sm:$0xff] %v267_v4 }
  0xed   :  { %v415_v26 = vpop.eup %414 }
  0xee   :  { %v344_v40 = vmul.f32 %v415_v26, %v342_v10 }
  0xf0   :  { %347 = vst [vmem:[#allocation7 + $0x38] sm:$0xff] %v344_v40 }
  0xf1   :  { %451 = shalt.err (!%p448_p0)
}
  0xf2   :  { %s452_s30 = scalar_lea.hbm %s639_s4, 1024 }
  0xf3   :  { %p453_p1 = scmp.ne.s32.totalorder %s639_s4, %s452_s30  ;;  %p456_p2 = scmp.lt.u32.totalorder %s452_s30, %s639_s4 }
  0xf5   :  { %p458_p3 = pnand %p456_p2, %p453_p1 }
  0xf7   :  { %461 = shalt.err (!%p458_p3)
}
  0xf8   :  { %s474_s9 = smov 128   ;;  %s475_s10 = smov 8  }
  0xf9   :  { %359 = dma.vmem_to_hbm [thread:$0]  %s354_s26, 1024, %s639_s4, [#allocation3], %s474_s9, %s474_s9, %s475_s10  }
  0xfa   :  { %466 = dma.done.wait [#allocation3], 1024  }
  0xfb   :  { %467 = vsyncadd [#allocation3], 4294966272 }
  0xfc   :  { %363 = vsyncpa [#allocation3], 1 }
  0xfd   :  { %364 = vsyncpa [#allocation4], 1 }
  0xfe   :  { %365 = vsyncpa [#allocation6], 1 }

</bundles_post_ra>
